<compile_context>
chip_gen: v6e
topology: v6e:2x2x1
jax: 0.10.0
libtpu: 0.0.40
codegen_flags: <defaults>
</compile_context>

<pallas_src>
import jax
import jax.numpy as jnp
from jax.experimental import pallas as pl
from jax.experimental.pallas import tpu as pltpu


def _round_up(x, m):
    return (x + m - 1) // m * m


def cbf_kernel(ue_ref, we_ref, de_ref, vu_ref, vw_ref, vd_ref, c_ref, out_ref):
    # Three folded GEMVs: [TB, 128] @ [128, 1] -> [TB, 1], f32 accumulate.
    s = jnp.dot(ue_ref[...], vu_ref[...], preferred_element_type=jnp.float32)
    s += jnp.dot(we_ref[...], vw_ref[...], preferred_element_type=jnp.float32)
    s += jnp.dot(de_ref[...], vd_ref[...], preferred_element_type=jnp.float32)
    out_ref[...] = s + c_ref[...]


def fold_params(params):
    """Fold the 3x Linear(128,64) + Linear(192,1) into 3 GEMV vectors + scalar."""
    wp = params["wp_t"]                                  # [192, 1]
    wp_u, wp_w, wp_d = wp[0:64], wp[64:128], wp[128:192]
    vu = params["wu_t"] @ wp_u                           # [128, 1]
    vw = params["ww_t"] @ wp_w                           # [128, 1]
    vd = params["wd_t"] @ wp_d                           # [128, 1]
    c = (params["bu"] @ wp_u + params["bw"] @ wp_w
         + params["bd"] @ wp_d + params["bp"])           # [1, 1]
    return vu, vw, vd, c


def cbf_forward(user_emb, workout_emb, diff_emb, vu, vw, vd, c, *, tb=1024):
    """user_emb/workout_emb/diff_emb: [B, 128] f32 gathered embedding rows."""
    B, D = user_emb.shape

    # Tile the batch; pad to a multiple of the tile so blocks satisfy the
    # (8, 128) constraint. Padded rows compute the constant c and are sliced off.
    TB = min(tb, _round_up(B, 8))
    B_pad = _round_up(B, TB)
    if B_pad != B:
        pad = ((0, B_pad - B), (0, 0))
        user_emb = jnp.pad(user_emb, pad)
        workout_emb = jnp.pad(workout_emb, pad)
        diff_emb = jnp.pad(diff_emb, pad)

    emb_spec = pl.BlockSpec((TB, D), lambda i: (i, 0))      # streamed per tile
    vec_spec = pl.BlockSpec((D, 1), lambda i: (0, 0))       # VMEM-resident
    c_spec = pl.BlockSpec((1, 1), lambda i: (0, 0))         # VMEM-resident

    out = pl.pallas_call(
        cbf_kernel,
        out_shape=jax.ShapeDtypeStruct((B_pad, 1), jnp.float32),
        grid_spec=pltpu.PrefetchScalarGridSpec(
            num_scalar_prefetch=0,
            grid=(B_pad // TB,),
            in_specs=[emb_spec, emb_spec, emb_spec,
                      vec_spec, vec_spec, vec_spec, c_spec],
            out_specs=pl.BlockSpec((TB, 1), lambda i: (i, 0)),
        ),
        compiler_params=pltpu.CompilerParams(
            dimension_semantics=("parallel",)),
    )(user_emb, workout_emb, diff_emb, vu, vw, vd, c)
    return out[:B]


def init_params(key, num_users, num_workouts, num_difficulty_levels):
    """Deterministic synthetic parameters matching the PyTorch module shapes."""
    ks = jax.random.split(key, 11)

    def uniform(k, shape, fan_in):
        bound = 1.0 / jnp.sqrt(fan_in)
        return jax.random.uniform(k, shape, jnp.float32, -bound, bound)

    params = {
        # embedding tables (nn.Embedding default init ~ N(0,1))
        "user_table": jax.random.normal(ks[0], (num_users, 128), jnp.float32),
        "workout_table": jax.random.normal(ks[1], (num_workouts, 128), jnp.float32),
        "difficulty_table": jax.random.normal(
            ks[2], (num_difficulty_levels, 128), jnp.float32),
        # Linear(128, 64) x3 — stored transposed [in, out]
        "wu_t": uniform(ks[3], (128, 64), 128),
        "bu": uniform(ks[4], (1, 64), 128),
        "ww_t": uniform(ks[5], (128, 64), 128),
        "bw": uniform(ks[6], (1, 64), 128),
        "wd_t": uniform(ks[7], (128, 64), 128),
        "bd": uniform(ks[8], (1, 64), 128),
        # predict_layer Linear(192, 1) — stored transposed [in, out]
        "wp_t": uniform(ks[9], (192, 1), 192),
        "bp": uniform(ks[10], (1, 1), 192),
    }
    return params


def cbf_apply(params, user_id, workout_id, difficulty_level_id, *, tb=1024):
    # Embedding lookup (gather) is glue in plain JAX; kernel does the math.
    # TODO(synk): fuse the gather into the kernel (scalar-prefetched ids +
    # manual per-row DMA into double-buffered VMEM tiles) to avoid writing the
    # gathered [B,128] rows to HBM and immediately re-reading them (~2x traffic).
    ue = params["user_table"][user_id]
    we = params["workout_table"][workout_id]
    de = params["difficulty_table"][difficulty_level_id]
    vu, vw, vd, c = fold_params(params)
    return cbf_forward(ue, we, de, vu, vw, vd, c, tb=tb)


def cbf_reference(params, user_id, workout_id, difficulty_level_id):
    """Pure-JAX reference of the (un-folded) PyTorch forward pass."""
    ue = params["user_table"][user_id]
    we = params["workout_table"][workout_id]
    de = params["difficulty_table"][difficulty_level_id]
    u = ue @ params["wu_t"] + params["bu"]
    w = we @ params["ww_t"] + params["bw"]
    d = de @ params["wd_t"] + params["bd"]
    emb = jnp.concatenate([u, w, d], axis=1)
    return emb @ params["wp_t"] + params["bp"]


if __name__ == "__main__":
    num_users, num_workouts, num_difficulty_levels = 16, 12, 5

    key = jax.random.PRNGKey(0)
    pkey, k_u, k_w, k_d, k_u2, k_w2, k_d2 = jax.random.split(key, 7)
    params = init_params(pkey, num_users, num_workouts, num_difficulty_levels)

    # Case 1: small batch, single tile.
    B = 8
    uid = jax.random.randint(k_u, (B,), 0, num_users, dtype=jnp.int32)
    wid = jax.random.randint(k_w, (B,), 0, num_workouts, dtype=jnp.int32)
    did = jax.random.randint(k_d, (B,), 0, num_difficulty_levels, dtype=jnp.int32)

    out = jax.block_until_ready(cbf_apply(params, uid, wid, did))
    ref = cbf_reference(params, uid, wid, did)
    assert out.shape == (B, 1), out.shape
    assert jnp.allclose(out, ref, atol=1e-4, rtol=1e-4), (out, ref)

    # Case 2: ragged batch with a small tile to exercise the multi-tile
    # streaming pipeline (grid > 1) and tail padding.
    B2 = 20
    uid2 = jax.random.randint(k_u2, (B2,), 0, num_users, dtype=jnp.int32)
    wid2 = jax.random.randint(k_w2, (B2,), 0, num_workouts, dtype=jnp.int32)
    did2 = jax.random.randint(k_d2, (B2,), 0, num_difficulty_levels, dtype=jnp.int32)

    out2 = jax.block_until_ready(cbf_apply(params, uid2, wid2, did2, tb=8))
    ref2 = cbf_reference(params, uid2, wid2, did2)
    assert out2.shape == (B2, 1), out2.shape
    assert jnp.allclose(out2, ref2, atol=1e-4, rtol=1e-4), (out2, ref2)

    print("KERNEL_OK")
</pallas_src>

<mosaic_0001>
module attributes {stable_mosaic.version = 11 : i64} {
  func.func @cbf_kernel(%arg0: i32, %arg1: memref<8x128xf32, #tpu.memory_space<vmem>>, %arg2: memref<8x128xf32, #tpu.memory_space<vmem>>, %arg3: memref<8x128xf32, #tpu.memory_space<vmem>>, %arg4: memref<128x1xf32, #tpu.memory_space<vmem>>, %arg5: memref<128x1xf32, #tpu.memory_space<vmem>>, %arg6: memref<128x1xf32, #tpu.memory_space<vmem>>, %arg7: memref<1x1xf32, #tpu.memory_space<vmem>>, %arg8: memref<8x1xf32, #tpu.memory_space<vmem>>) attributes {dimension_semantics = [#tpu.dimension_semantics<parallel>], iteration_bounds = array<i64: 1>, scalar_prefetch = 0 : i64, scratch_operands = 0 : i64, tpu.core_type = #tpu.core_type<tc>, window_params = [{transform_indices = @transform_0, window_bounds = array<i64: 8, 128>}, {transform_indices = @transform_1, window_bounds = array<i64: 8, 128>}, {transform_indices = @transform_2, window_bounds = array<i64: 8, 128>}, {pipeline_mode = #tpu.pipeline_mode<synchronous>, transform_indices = @transform_3, window_bounds = array<i64: 128, 1>}, {pipeline_mode = #tpu.pipeline_mode<synchronous>, transform_indices = @transform_4, window_bounds = array<i64: 128, 1>}, {pipeline_mode = #tpu.pipeline_mode<synchronous>, transform_indices = @transform_5, window_bounds = array<i64: 128, 1>}, {pipeline_mode = #tpu.pipeline_mode<synchronous>, transform_indices = @transform_6, window_bounds = array<i64: 1, 1>}, {transform_indices = @transform_7, window_bounds = array<i64: 8, 1>}]} {
    %c0 = arith.constant 0 : index
    %c0_0 = arith.constant 0 : index
    %0 = vector.load %arg1[%c0, %c0_0] : memref<8x128xf32, #tpu.memory_space<vmem>>, vector<8x128xf32>
    %c0_1 = arith.constant 0 : index
    %c0_2 = arith.constant 0 : index
    %1 = vector.load %arg4[%c0_1, %c0_2] : memref<128x1xf32, #tpu.memory_space<vmem>>, vector<128x1xf32>
    %cst = arith.constant dense<0.000000e+00> : vector<8x1xf32>
    %2 = tpu.matmul %0, %1, %cst {dimension_numbers = #tpu.dot_dimension_numbers<[1], [0], [0], [1], [0, 0, 1, 1], [], []>} : vector<8x128xf32>, vector<128x1xf32>, vector<8x1xf32> -> vector<8x1xf32>
    %c0_3 = arith.constant 0 : index
    %c0_4 = arith.constant 0 : index
    %3 = vector.load %arg2[%c0_3, %c0_4] : memref<8x128xf32, #tpu.memory_space<vmem>>, vector<8x128xf32>
    %c0_5 = arith.constant 0 : index
    %c0_6 = arith.constant 0 : index
    %4 = vector.load %arg5[%c0_5, %c0_6] : memref<128x1xf32, #tpu.memory_space<vmem>>, vector<128x1xf32>
    %cst_7 = arith.constant dense<0.000000e+00> : vector<8x1xf32>
    %5 = tpu.matmul %3, %4, %cst_7 {dimension_numbers = #tpu.dot_dimension_numbers<[1], [0], [0], [1], [0, 0, 1, 1], [], []>} : vector<8x128xf32>, vector<128x1xf32>, vector<8x1xf32> -> vector<8x1xf32>
    %6 = arith.addf %2, %5 : vector<8x1xf32>
    %c0_8 = arith.constant 0 : index
    %c0_9 = arith.constant 0 : index
    %7 = vector.load %arg3[%c0_8, %c0_9] : memref<8x128xf32, #tpu.memory_space<vmem>>, vector<8x128xf32>
    %c0_10 = arith.constant 0 : index
    %c0_11 = arith.constant 0 : index
    %8 = vector.load %arg6[%c0_10, %c0_11] : memref<128x1xf32, #tpu.memory_space<vmem>>, vector<128x1xf32>
    %cst_12 = arith.constant dense<0.000000e+00> : vector<8x1xf32>
    %9 = tpu.matmul %7, %8, %cst_12 {dimension_numbers = #tpu.dot_dimension_numbers<[1], [0], [0], [1], [0, 0, 1, 1], [], []>} : vector<8x128xf32>, vector<128x1xf32>, vector<8x1xf32> -> vector<8x1xf32>
    %10 = arith.addf %6, %9 : vector<8x1xf32>
    %c0_13 = arith.constant 0 : index
    %c0_14 = arith.constant 0 : index
    %11 = vector.load %arg7[%c0_13, %c0_14] : memref<1x1xf32, #tpu.memory_space<vmem>>, vector<1x1xf32>
    %12 = vector.broadcast %11 : vector<1x1xf32> to vector<8x1xf32>
    %13 = arith.addf %10, %12 : vector<8x1xf32>
    %c0_15 = arith.constant 0 : index
    %c0_16 = arith.constant 0 : index
    %14 = vector.load %arg8[%c0_15, %c0_16] : memref<8x1xf32, #tpu.memory_space<vmem>>, vector<8x1xf32>
    tpu.vector_store %arg8[%c0_15, %c0_16], %13 {strides = array<i32>} : memref<8x1xf32, #tpu.memory_space<vmem>>, vector<8x1xf32>,
    return
  }
  func.func @transform_0(%arg0: i32) -> (i32, i32) {
    %c0_i32 = arith.constant 0 : i32
    %c0_i32_0 = arith.constant 0 : i32
    return %arg0, %c0_i32 : i32, i32
  }
  func.func @transform_1(%arg0: i32) -> (i32, i32) {
    %c0_i32 = arith.constant 0 : i32
    %c0_i32_0 = arith.constant 0 : i32
    return %arg0, %c0_i32 : i32, i32
  }
  func.func @transform_2(%arg0: i32) -> (i32, i32) {
    %c0_i32 = arith.constant 0 : i32
    %c0_i32_0 = arith.constant 0 : i32
    return %arg0, %c0_i32 : i32, i32
  }
  func.func @transform_3(%arg0: i32) -> (i32, i32) {
    %c0_i32 = arith.constant 0 : i32
    %c0_i32_0 = arith.constant 0 : i32
    %c0_i32_1 = arith.constant 0 : i32
    return %c0_i32, %c0_i32_0 : i32, i32
  }
  func.func @transform_4(%arg0: i32) -> (i32, i32) {
    %c0_i32 = arith.constant 0 : i32
    %c0_i32_0 = arith.constant 0 : i32
    %c0_i32_1 = arith.constant 0 : i32
    return %c0_i32, %c0_i32_0 : i32, i32
  }
  func.func @transform_5(%arg0: i32) -> (i32, i32) {
    %c0_i32 = arith.constant 0 : i32
    %c0_i32_0 = arith.constant 0 : i32
    %c0_i32_1 = arith.constant 0 : i32
    return %c0_i32, %c0_i32_0 : i32, i32
  }
  func.func @transform_6(%arg0: i32) -> (i32, i32) {
    %c0_i32 = arith.constant 0 : i32
    %c0_i32_0 = arith.constant 0 : i32
    %c0_i32_1 = arith.constant 0 : i32
    return %c0_i32, %c0_i32_0 : i32, i32
  }
  func.func @transform_7(%arg0: i32) -> (i32, i32) {
    %c0_i32 = arith.constant 0 : i32
    %c0_i32_0 = arith.constant 0 : i32
    return %arg0, %c0_i32 : i32, i32
  }
}

</mosaic_0001>

<bundles_post_ra>
// kernel: tpu_custom_call.1
= control target key start
LH: loop header
LB: loop body
LE: loop exit
PB: predicated region body
PF: predicated region fallthrough
CT: control target
= control target key end

     0   :  { %v463_v0 = vmov 0.0   ;;  %vm464_vm0 = vmmov 0   ;;  %vm298_vm1 = vcmask 7168   ;;  %s715_s4 = inlined_call_operand.vmem [shape: f32[128,1], index: 4, kind: input, shape index: {}]   ;;  %s716_s3 = inlined_call_operand.vmem [shape: f32[128,1], index: 3, kind: input, shape index: {}]   ;;  %s717_s1 = inlined_call_operand.vmem [shape: f32[8,128], index: 1, kind: input, shape index: {}]   ;;  %s718_s0 = inlined_call_operand.vmem [shape: f32[8,128], index: 0, kind: input, shape index: {}]   ;;  %s719_s5 = inlined_call_operand.vmem [shape: f32[128,1], index: 5, kind: input, shape index: {}]   ;;  %s720_s2 = inlined_call_operand.vmem [shape: f32[8,128], index: 2, kind: input, shape index: {}]   ;;  %s721_s6 = inlined_call_operand.<no memory space> [shape: f32[1,1], index: 6, kind: input, shape index: {}]   ;;  %s722_s7 = inlined_call_operand.vmem [shape: f32[8,1], index: 7, kind: output, shape index: {}]  }
   0x1   :  { %356 = vmatprep.subr.mxu0 %v463_v0  ;;  %v61_v1 = vld [vmem:[%s715_s4 + $0x78] sm:$0xff]  ;;  %391 = vmatprep.subr.mxu1 %v463_v0  ;;  %v60_v3 = vld [vmem:[%s715_s4 + $0x70] sm:$0xff]  ;;  %v59_v5 = vld [vmem:[%s715_s4 + $0x68] sm:$0xff]  ;;  %v12_v52 = vstv %s721_s6 }
   0x2   :  { %v44_v2 = vld [vmem:[%s716_s3 + $0x78] sm:$0xff]  ;;  %357 = vmatpush3.msra.mxu0 %v61_v1  ;;  %v43_v4 = vld [vmem:[%s716_s3 + $0x70] sm:$0xff]  ;;  %v42_v6 = vld [vmem:[%s716_s3 + $0x68] sm:$0xff]  ;;  %388 = vmatprep.mubr.msk.f32.mxu0 %vm464_vm0, %v463_v0  ;;  %13 = vst [vmem:[#allocation2] sm:$0x1] %v12_v52 }
   0x3   :  { %392 = vmatpush3.msra.mxu1 %v44_v2  ;;  %358 = vmatprep.subr.mxu0 %v463_v0  ;;  %v58_v7 = vld [vmem:[%s715_s4 + $0x60] sm:$0xff]  ;;  %v57_v9 = vld [vmem:[%s715_s4 + $0x58] sm:$0xff]  ;;  %v56_v11 = vld [vmem:[%s715_s4 + $0x50] sm:$0xff] }
   0x4   :  { %393 = vmatprep.subr.mxu1 %v463_v0  ;;  %359 = vmatpush3.msra.mxu0 %v60_v3  ;;  %v41_v8 = vld [vmem:[%s716_s3 + $0x60] sm:$0xff]  ;;  %v40_v10 = vld [vmem:[%s716_s3 + $0x58] sm:$0xff]  ;;  %v39_v12 = vld [vmem:[%s716_s3 + $0x50] sm:$0xff] }
   0x5   :  { %394 = vmatpush3.msra.mxu1 %v43_v4  ;;  %360 = vmatprep.subr.mxu0 %v463_v0  ;;  %v55_v13 = vld [vmem:[%s715_s4 + $0x48] sm:$0xff]  ;;  %v54_v15 = vld [vmem:[%s715_s4 + $0x40] sm:$0xff]  ;;  %v53_v17 = vld [vmem:[%s715_s4 + $0x38] sm:$0xff] }
   0x6   :  { %395 = vmatprep.subr.mxu1 %v463_v0  ;;  %361 = vmatpush3.msra.mxu0 %v59_v5  ;;  %v38_v14 = vld [vmem:[%s716_s3 + $0x48] sm:$0xff]  ;;  %v37_v16 = vld [vmem:[%s716_s3 + $0x40] sm:$0xff]  ;;  %v36_v18 = vld [vmem:[%s716_s3 + $0x38] sm:$0xff] }
   0x7   :  { %396 = vmatpush3.msra.mxu1 %v42_v6  ;;  %362 = vmatprep.subr.mxu0 %v463_v0  ;;  %v52_v19 = vld [vmem:[%s715_s4 + $0x30] sm:$0xff]  ;;  %v51_v21 = vld [vmem:[%s715_s4 + $0x28] sm:$0xff]  ;;  %v50_v23 = vld [vmem:[%s715_s4 + $0x20] sm:$0xff] }
   0x8   :  { %397 = vmatprep.subr.mxu1 %v463_v0  ;;  %363 = vmatpush3.msra.mxu0 %v58_v7  ;;  %v35_v20 = vld [vmem:[%s716_s3 + $0x30] sm:$0xff]  ;;  %v34_v22 = vld [vmem:[%s716_s3 + $0x28] sm:$0xff]  ;;  %v33_v24 = vld [vmem:[%s716_s3 + $0x20] sm:$0xff] }
   0x9   :  { %398 = vmatpush3.msra.mxu1 %v41_v8  ;;  %364 = vmatprep.subr.mxu0 %v463_v0  ;;  %v49_v25 = vld [vmem:[%s715_s4 + $0x18] sm:$0xff]  ;;  %v48_v27 = vld [vmem:[%s715_s4 + $0x10] sm:$0xff]  ;;  %v47_v29 = vld [vmem:[%s715_s4 + $0x8] sm:$0xff] }
   0xa   :  { %399 = vmatprep.subr.mxu1 %v463_v0  ;;  %365 = vmatpush3.msra.mxu0 %v57_v9  ;;  %v32_v26 = vld [vmem:[%s716_s3 + $0x18] sm:$0xff]  ;;  %v31_v28 = vld [vmem:[%s716_s3 + $0x10] sm:$0xff]  ;;  %v30_v30 = vld [vmem:[%s716_s3 + $0x8] sm:$0xff] }
   0xb   :  { %400 = vmatpush3.msra.mxu1 %v40_v10  ;;  %366 = vmatprep.subr.mxu0 %v463_v0  ;;  %v46_v31 = vld [vmem:[%s715_s4] sm:$0xff]  ;;  %v218_v35 = vld [vmem:[%s719_s5 + $0x78] sm:$0xff]  ;;  %v217_v36 = vld [vmem:[%s719_s5 + $0x70] sm:$0xff] }
   0xc   :  { %401 = vmatprep.subr.mxu1 %v463_v0  ;;  %367 = vmatpush3.msra.mxu0 %v56_v11  ;;  %v45_v32 = vld [vmem:[%s717_s1] sm:$0xff]  ;;  %v216_v37 = vld [vmem:[%s719_s5 + $0x68] sm:$0xff]  ;;  %v214_v39 = vld [vmem:[%s719_s5 + $0x58] sm:$0xff] }
   0xd   :  { %402 = vmatpush3.msra.mxu1 %v39_v12  ;;  %368 = vmatprep.subr.mxu0 %v463_v0  ;;  %v29_v33 = vld [vmem:[%s716_s3] sm:$0xff]  ;;  %v213_v40 = vld [vmem:[%s719_s5 + $0x50] sm:$0xff]  ;;  %v212_v41 = vld [vmem:[%s719_s5 + $0x48] sm:$0xff] }
   0xe   :  { %403 = vmatprep.subr.mxu1 %v463_v0  ;;  %369 = vmatpush3.msra.mxu0 %v55_v13  ;;  %v28_v34 = vld [vmem:[%s718_s0] sm:$0xff]  ;;  %v210_v43 = vld [vmem:[%s719_s5 + $0x38] sm:$0xff]  ;;  %v209_v44 = vld [vmem:[%s719_s5 + $0x30] sm:$0xff] }
   0xf   :  { %404 = vmatpush3.msra.mxu1 %v38_v14  ;;  %370 = vmatprep.subr.mxu0 %v463_v0  ;;  %v215_v38 = vld [vmem:[%s719_s5 + $0x60] sm:$0xff]  ;;  %v208_v45 = vld [vmem:[%s719_s5 + $0x28] sm:$0xff]  ;;  %v206_v47 = vld [vmem:[%s719_s5 + $0x18] sm:$0xff] }
  0x10   :  { %405 = vmatprep.subr.mxu1 %v463_v0  ;;  %371 = vmatpush3.msra.mxu0 %v54_v15  ;;  %v211_v42 = vld [vmem:[%s719_s5 + $0x40] sm:$0xff]  ;;  %v205_v48 = vld [vmem:[%s719_s5 + $0x10] sm:$0xff]  ;;  %v204_v49 = vld [vmem:[%s719_s5 + $0x8] sm:$0xff] }
  0x11   :  { %406 = vmatpush3.msra.mxu1 %v37_v16  ;;  %372 = vmatprep.subr.mxu0 %v463_v0  ;;  %v207_v46 = vld [vmem:[%s719_s5 + $0x20] sm:$0xff] }
  0x12   :  { %407 = vmatprep.subr.mxu1 %v463_v0  ;;  %373 = vmatpush3.msra.mxu0 %v53_v17  ;;  %v203_v50 = vld [vmem:[%s719_s5] sm:$0xff] }
  0x13   :  { %408 = vmatpush3.msra.mxu1 %v36_v18  ;;  %374 = vmatprep.subr.mxu0 %v463_v0  ;;  %v202_v51 = vld [vmem:[%s720_s2] sm:$0xff] }
  0x14   :  { %409 = vmatprep.subr.mxu1 %v463_v0  ;;  %375 = vmatpush3.msra.mxu0 %v52_v19  ;;  %v304_v59 = vld [vmem:[#allocation2] ss:$0 sm:$0xff] }
  0x15   :  { %410 = vmatpush3.msra.mxu1 %v35_v20  ;;  %376 = vmatprep.subr.mxu0 %v463_v0 }
  0x16   :  { %411 = vmatprep.subr.mxu1 %v463_v0  ;;  %377 = vmatpush3.msra.mxu0 %v51_v21 }
  0x17   :  { %412 = vmatpush3.msra.mxu1 %v34_v22  ;;  %378 = vmatprep.subr.mxu0 %v463_v0 }
  0x18   :  { %413 = vmatprep.subr.mxu1 %v463_v0  ;;  %379 = vmatpush3.msra.mxu0 %v50_v23 }
  0x19   :  { %414 = vmatpush3.msra.mxu1 %v33_v24  ;;  %380 = vmatprep.subr.mxu0 %v463_v0 }
  0x1a   :  { %415 = vmatprep.subr.mxu1 %v463_v0  ;;  %381 = vmatpush3.msra.mxu0 %v49_v25 }
  0x1b   :  { %416 = vmatpush3.msra.mxu1 %v32_v26  ;;  %382 = vmatprep.subr.mxu0 %v463_v0 }
  0x1c   :  { %417 = vmatprep.subr.mxu1 %v463_v0  ;;  %383 = vmatpush3.msra.mxu0 %v48_v27 }
  0x1d   :  { %418 = vmatpush3.msra.mxu1 %v31_v28  ;;  %384 = vmatprep.subr.mxu0 %v463_v0 }
  0x1e   :  { %419 = vmatprep.subr.mxu1 %v463_v0  ;;  %385 = vmatpush3.msra.mxu0 %v47_v29 }
  0x1f   :  { %420 = vmatpush3.msra.mxu1 %v30_v30  ;;  %386 = vmatprep.subr.mxu0 %v463_v0 }
  0x20   :  { %387 = vmatpush3.msra.mxu0 %v46_v31  ;;  %421 = vmatprep.subr.mxu1 %v463_v0 }
  0x21   :  { %389 = vmatmul.mubr.f32.vlgmr.msra.gmra.mxu0 %v45_v32  ;;  %422 = vmatpush3.msra.mxu1 %v29_v33 }
  0x22   :  { %423 = vmatprep.mubr.msk.f32.mxu1 %vm464_vm0, %v463_v0  ;;  %426 = vmatprep.subr.mxu0 %v463_v0 }
  0x23   :  { %424 = vmatmul.mubr.f32.vlgmr.msra.gmra.mxu1 %v28_v34  ;;  %427 = vmatpush3.msra.mxu0 %v218_v35 }
  0x24   :  { %428 = vmatprep.subr.mxu0 %v463_v0  ;;  %458 = vmatprep.mubr.msk.f32.mxu0 %vm464_vm0, %v463_v0 }
  0x25   :  { %429 = vmatpush3.msra.mxu0 %v217_v36 }
  0x26   :  { %430 = vmatprep.subr.mxu0 %v463_v0 }
  0x27   :  { %431 = vmatpush3.msra.mxu0 %v216_v37 }
  0x28   :  { %432 = vmatprep.subr.mxu0 %v463_v0 }
  0x29   :  { %433 = vmatpush3.msra.mxu0 %v215_v38 }
  0x2a   :  { %434 = vmatprep.subr.mxu0 %v463_v0 }
  0x2b   :  { %435 = vmatpush3.msra.mxu0 %v214_v39 }
  0x2c   :  { %436 = vmatprep.subr.mxu0 %v463_v0 }
  0x2d   :  { %437 = vmatpush3.msra.mxu0 %v213_v40 }
  0x2e   :  { %438 = vmatprep.subr.mxu0 %v463_v0 }
  0x2f   :  { %439 = vmatpush3.msra.mxu0 %v212_v41 }
  0x30   :  { %440 = vmatprep.subr.mxu0 %v463_v0 }
  0x31   :  { %441 = vmatpush3.msra.mxu0 %v211_v42 }
  0x32   :  { %442 = vmatprep.subr.mxu0 %v463_v0 }
  0x33   :  { %443 = vmatpush3.msra.mxu0 %v210_v43 }
  0x34   :  { %444 = vmatprep.subr.mxu0 %v463_v0 }
  0x35   :  { %445 = vmatpush3.msra.mxu0 %v209_v44 }
  0x36   :  { %446 = vmatprep.subr.mxu0 %v463_v0 }
  0x37   :  { %447 = vmatpush3.msra.mxu0 %v208_v45 }
  0x38   :  { %448 = vmatprep.subr.mxu0 %v463_v0 }
  0x39   :  { %449 = vmatpush3.msra.mxu0 %v207_v46 }
  0x3a   :  { %450 = vmatprep.subr.mxu0 %v463_v0 }
  0x3b   :  { %451 = vmatpush3.msra.mxu0 %v206_v47 }
  0x3c   :  { %452 = vmatprep.subr.mxu0 %v463_v0 }
  0x3d   :  { %453 = vmatpush3.msra.mxu0 %v205_v48 }
  0x3e   :  { %454 = vmatprep.subr.mxu0 %v463_v0 }
  0x3f   :  { %455 = vmatpush3.msra.mxu0 %v204_v49 }
  0x40   :  { %456 = vmatprep.subr.mxu0 %v463_v0 }
  0x41   :  { %457 = vmatpush3.msra.mxu0 %v203_v50 }
  0x42   :  { %459 = vmatmul.mubr.f32.vlgmr.msra.gmra.mxu0 %v202_v51 }
  0xe1   :  { %v128_v53 = vpop.f32.mrf.mxu0 }
  0xe3   :  { %v198_v54 = vpop.f32.mrf.mxu1  ;;  %v390_v55 = vpop.f32.mrf.mxu0 }
  0xe4   :  { %v199_v57 = vadd.f32 %v198_v54, %v128_v53 }
  0xe5   :  { %v425_v56 = vpop.f32.mrf.mxu1 }
 0x102   :  { %v285_v58 = vpop.f32.mrf.mxu0 }
 0x103   :  { %v289_v60 = vadd.f32 %v285_v58, %v199_v57 }
 0x104   :  { %v460_v61 = vpop.f32.mrf.mxu0 }
 0x105   :  { %v297_v62 = vadd.f32 %v304_v59, %v289_v60 }
 0x107   :  { %299 = vst.msk [vmem:[%s722_s7] sm:$0xff] %vm298_vm1, %v297_v62 }

</bundles_post_ra>
